<compile_context>
chip_gen: v7x
topology: tpu7x:2x2x1
jax: 0.10.0
libtpu: 0.0.40
codegen_flags: <defaults>
</compile_context>

<pallas_src>
import jax
import jax.numpy as jnp
from jax import lax
from jax.experimental import pallas as pl
from jax.experimental.pallas import tpu as pltpu


_LANES = 128
_ROW_PACK = 32      # row-tile multiple that keeps f32/bf16/int8 sublane-dense


def _tensorcores_per_chip() -> int:
    """2 on v7x (2 TensorCores / chip), 1 on v5e / v6e / unknown."""
    try:
        kind = jax.devices()[0].device_kind.lower()
    except Exception:
        return 1
    return 2 if "v7" in kind else 1


def _make_kernel(n, tr, cs, steps, r_rows, ragged):
    """Partial-sum kernel for (n, R, 128) inputs, block = (n, tr, 128).

    oi_ref / os_ref are (n, 128) f32 accumulators whose output block index is
    constant along the reduction axis, so they stay VMEM-resident.
    """

    def accumulate(p_ref, t_ref, oi_ref, os_ref, valid_rows):
        # Reduce the row axis in chunks of `cs` rows so only a few
        # (n, cs, 128) f32 slabs are live, independent of block size.
        def add_chunk(lo, rows):
            p = p_ref[:, pl.ds(lo, rows), :].astype(jnp.float32)
            t = t_ref[:, pl.ds(lo, rows), :].astype(jnp.float32)
            pt = p * t
            ps = p + t
            if valid_rows is not None:
                row_id = lo + lax.broadcasted_iota(jnp.int32, (n, rows, _LANES), 1)
                keep = row_id < valid_rows
                pt = jnp.where(keep, pt, 0.0)
                ps = jnp.where(keep, ps, 0.0)
            oi_ref[...] += jnp.sum(pt, axis=1)
            os_ref[...] += jnp.sum(ps, axis=1)

        n_full, tail = tr // cs, tr % cs
        if n_full == 1 and tail == 0:
            add_chunk(0, cs)                      # static, no dynamic slice
        else:
            def body(i, carry):
                add_chunk(pl.multiple_of(i * cs, cs), cs)
                return carry
            lax.fori_loop(0, n_full, body, 0)
            if tail:
                add_chunk(n_full * cs, tail)

    def kernel(p_ref, t_ref, oi_ref, os_ref):
        k = pl.program_id(1)

        @pl.when(k == 0)
        def _init():
            oi_ref[...] = jnp.zeros_like(oi_ref)
            os_ref[...] = jnp.zeros_like(os_ref)

        if not ragged:
            accumulate(p_ref, t_ref, oi_ref, os_ref, None)
        else:
            c = pl.program_id(0)
            valid = r_rows - (c * steps + k) * tr   # rows of this block inside R

            @pl.when(valid >= tr)                   # interior block: no mask
            def _full():
                accumulate(p_ref, t_ref, oi_ref, os_ref, None)

            @pl.when(jnp.logical_and(valid > 0, valid < tr))   # ragged tail
            def _partial():
                accumulate(p_ref, t_ref, oi_ref, os_ref, valid)
            # valid <= 0 (possible only with a core split): block is entirely
            # past R -> skip; its DMA index is clamped in the index_map.

    return kernel


def soft_dice_loss(probs, targets, *, vmem_block_bytes=4 << 20):
    """Pallas TPU implementation of SoftDiceLoss.forward(probs, targets)."""
    assert probs.shape == targets.shape
    num = probs.shape[0]

    # Flatten exactly like torch .view(num, -1).
    p2 = probs.reshape(num, -1)
    t2 = targets.reshape(num, -1)
    n, d = p2.shape

    # Copy-free lane-dense layout when D is a lane multiple (the common case).
    # Only the rare D % 128 != 0 case still pads (zeros are neutral for all
    # sums); the 8*128-group padding of the old version is gone.
    if d % _LANES != 0:
        pad = _LANES - d % _LANES
        p2 = jnp.pad(p2, ((0, 0), (0, pad)))
        t2 = jnp.pad(t2, ((0, 0), (0, pad)))
        d += pad
    r_rows = d // _LANES
    p3 = p2.reshape(n, r_rows, _LANES)
    t3 = t2.reshape(n, r_rows, _LANES)

    p_item = jnp.dtype(p3.dtype).itemsize
    t_item = jnp.dtype(t3.dtype).itemsize
    max_item = max(p_item, t_item)

    # ---- tiling -----------------------------------------------------------
    core_split = _tensorcores_per_chip()
    if r_rows < 2 * _ROW_PACK:
        core_split = 1                      # too little work to split cores

    rows_budget = max(1, vmem_block_bytes // (n * _LANES * max_item))
    if rows_budget >= _ROW_PACK:
        rows_budget = (rows_budget // _ROW_PACK) * _ROW_PACK
    else:
        # Very large batch: fall back to the smallest aligned row tile.
        rows_budget = max(8, (rows_budget // 8) * 8)

    r_per_core = pl.cdiv(r_rows, core_split)
    if core_split == 1 and r_rows <= rows_budget:
        tr = r_rows                         # whole reduction fits one block
    else:
        tr = min(rows_budget, pl.cdiv(r_per_core, _ROW_PACK) * _ROW_PACK)
    steps = pl.cdiv(r_rows, core_split * tr)
    ragged = (core_split * steps * tr) != r_rows

    # f32 chunk rows inside the kernel (bounds in-kernel temporaries ~2 MiB).
    cs_budget = max(8, ((2 << 20) // (n * _LANES * 16) // 8) * 8)
    cs = max(1, min(tr, cs_budget))

    # ---- specs ------------------------------------------------------------
    last_blk = pl.cdiv(r_rows, tr) - 1
    if core_split * steps - 1 > last_blk:
        # With a core split, trailing blocks of the last core may start past R;
        # clamp their DMA to the last real block (the kernel skips them).
        in_map = lambda c, k: (0, jnp.minimum(c * steps + k, last_blk), 0)
    else:
        in_map = lambda c, k: (0, c * steps + k, 0)
    out_map = lambda c, k: (c, 0, 0)

    in_spec = pl.BlockSpec((n, tr, _LANES), in_map)
    acc_spec = pl.BlockSpec((None, n, _LANES), out_map)
    acc_shape = jax.ShapeDtypeStruct((core_split, n, _LANES), jnp.float32)

    if core_split > 1:
        core_sem = getattr(pltpu, "CORE_PARALLEL", "parallel")
    else:
        core_sem = "arbitrary"

    # Actual VMEM demand: double-buffered input blocks + f32 chunk temps +
    # resident accumulators.  Only override the scoped default (16 MiB on
    # v5e) when the big blocks actually need it.
    need = (2 * n * tr * _LANES * (p_item + t_item)
            + 4 * n * cs * _LANES * 4
            + 4 * core_split * n * _LANES * 4)
    vmem_limit = int(max(need + (4 << 20), 32 << 20)) if need > (12 << 20) else None

    cost = pl.CostEstimate(
        flops=4 * n * d,
        transcendentals=0,
        bytes_accessed=n * d * (p_item + t_item) + 2 * core_split * n * _LANES * 4,
    )

    kernel = _make_kernel(n, tr, cs, steps, r_rows, ragged)

    oi, osum = pl.pallas_call(
        kernel,
        out_shape=(acc_shape, acc_shape),
        grid_spec=pltpu.PrefetchScalarGridSpec(
            num_scalar_prefetch=0,
            grid=(core_split, steps),
            in_specs=[in_spec, in_spec],
            out_specs=[acc_spec, acc_spec],
        ),
        compiler_params=pltpu.CompilerParams(
            dimension_semantics=(core_sem, "arbitrary"),
            vmem_limit_bytes=vmem_limit,
        ),
        cost_estimate=cost,
    )(p3, t3)

    # Cheap glue: final cross-lane reduce of the tiny (core_split, n, 128)
    # partials and the dice-score formula.
    intersection = jnp.sum(oi, axis=(0, 2))          # (n,)
    s1_plus_s2 = jnp.sum(osum, axis=(0, 2))          # (n,)

    score = 2.0 * (intersection + 1.0) / (s1_plus_s2 + 1.0)
    loss = 1.0 - jnp.sum(score) / n
    # torch `max(score, 0)` clamps the returned loss value at zero.
    return jnp.maximum(loss, 0.0)


def _reference(probs, targets):
    num = probs.shape[0]
    m1 = probs.reshape(num, -1).astype(jnp.float32)
    m2 = targets.reshape(num, -1).astype(jnp.float32)
    inter = (m1 * m2).sum(1)
    score = 2.0 * (inter + 1.0) / (m1.sum(1) + m2.sum(1) + 1.0)
    score = 1.0 - score.sum() / num
    return jnp.maximum(score, 0.0)


if __name__ == "__main__":
    key = jax.random.PRNGKey(0)
    k1, k2 = jax.random.split(key)

    # NCHW inputs, small shapes: batch=2, channels=4, spatial=16x16
    probs = jax.random.uniform(k1, (2, 4, 16, 16), dtype=jnp.float32)
    targets = (jax.random.uniform(k2, (2, 4, 16, 16)) > 0.5).astype(jnp.float32)

    loss_fn = jax.jit(soft_dice_loss)
    loss = loss_fn(probs, targets)
    jax.block_until_ready(loss)

    ref = _reference(probs, targets)
    assert jnp.allclose(loss, ref, rtol=1e-5, atol=1e-5), (loss, ref)

    print("KERNEL_OK")
</pallas_src>

<mosaic_0001>
module attributes {stable_mosaic.version = 11 : i64} {
  func.func @kernel(%arg0: i32, %arg1: i32, %arg2: memref<2x8x128xf32, #tpu.memory_space<vmem>>, %arg3: memref<2x8x128xf32, #tpu.memory_space<vmem>>, %arg4: memref<1x2x128xf32, #tpu.memory_space<vmem>>, %arg5: memref<1x2x128xf32, #tpu.memory_space<vmem>>) attributes {dimension_semantics = [#tpu.dimension_semantics<arbitrary>, #tpu.dimension_semantics<arbitrary>], iteration_bounds = array<i64: 1, 1>, scalar_prefetch = 0 : i64, scratch_operands = 0 : i64, tpu.core_type = #tpu.core_type<tc>, window_params = [{transform_indices = @transform_0, window_bounds = array<i64: 2, 8, 128>}, {transform_indices = @transform_1, window_bounds = array<i64: 2, 8, 128>}, {transform_indices = @transform_2, window_bounds = array<i64: 1, 2, 128>}, {transform_indices = @transform_3, window_bounds = array<i64: 1, 2, 128>}]} {
    %c0_i32 = arith.constant 0 : i32
    %0 = arith.cmpi eq, %arg1, %c0_i32 : i32
    %1 = arith.extui %0 : i1 to i32
    %c0_i32_0 = arith.constant 0 : i32
    %2 = arith.cmpi ne, %1, %c0_i32_0 : i32
    scf.if %2 {
      %cst_19 = arith.constant 0.000000e+00 : f32
      %21 = vector.broadcast %cst_19 : f32 to vector<2x128xf32>
      %c0_20 = arith.constant 0 : index
      %c0_21 = arith.constant 0 : index
      %c0_22 = arith.constant 0 : index
      %22 = vector.load %arg4[%c0_20, %c0_21, %c0_22] : memref<1x2x128xf32, #tpu.memory_space<vmem>>, vector<1x2x128xf32>
      %23 = vector.shape_cast %22 : vector<1x2x128xf32> to vector<2x128xf32>
      %24 = vector.shape_cast %21 : vector<2x128xf32> to vector<1x2x128xf32>
      tpu.vector_store %arg4[%c0_20, %c0_21, %c0_22], %24 {strides = array<i32>} : memref<1x2x128xf32, #tpu.memory_space<vmem>>, vector<1x2x128xf32>,
      %cst_23 = arith.constant 0.000000e+00 : f32
      %25 = vector.broadcast %cst_23 : f32 to vector<2x128xf32>
      %c0_24 = arith.constant 0 : index
      %c0_25 = arith.constant 0 : index
      %c0_26 = arith.constant 0 : index
      %26 = vector.load %arg5[%c0_24, %c0_25, %c0_26] : memref<1x2x128xf32, #tpu.memory_space<vmem>>, vector<1x2x128xf32>
      %27 = vector.shape_cast %26 : vector<1x2x128xf32> to vector<2x128xf32>
      %28 = vector.shape_cast %25 : vector<2x128xf32> to vector<1x2x128xf32>
      tpu.vector_store %arg5[%c0_24, %c0_25, %c0_26], %28 {strides = array<i32>} : memref<1x2x128xf32, #tpu.memory_space<vmem>>, vector<1x2x128xf32>,
    } else {
    }
    %c0 = arith.constant 0 : index
    %c0_1 = arith.constant 0 : index
    %c0_2 = arith.constant 0 : index
    %3 = vector.load %arg2[%c0, %c0_1, %c0_2] : memref<2x8x128xf32, #tpu.memory_space<vmem>>, vector<2x8x128xf32>
    %c0_3 = arith.constant 0 : index
    %c0_4 = arith.constant 0 : index
    %c0_5 = arith.constant 0 : index
    %4 = vector.load %arg3[%c0_3, %c0_4, %c0_5] : memref<2x8x128xf32, #tpu.memory_space<vmem>>, vector<2x8x128xf32>
    %5 = arith.mulf %3, %4 : vector<2x8x128xf32>
    %6 = arith.addf %3, %4 : vector<2x8x128xf32>
    %c0_6 = arith.constant 0 : index
    %c0_7 = arith.constant 0 : index
    %c0_8 = arith.constant 0 : index
    %7 = vector.load %arg4[%c0_6, %c0_7, %c0_8] : memref<1x2x128xf32, #tpu.memory_space<vmem>>, vector<1x2x128xf32>
    %8 = vector.shape_cast %7 : vector<1x2x128xf32> to vector<2x128xf32>
    %cst = arith.constant dense<0.000000e+00> : vector<2x128xf32>
    %9 = vector.multi_reduction <add>, %5, %cst [1] : vector<2x8x128xf32> to vector<2x128xf32>
    %10 = arith.addf %8, %9 : vector<2x128xf32>
    %c0_9 = arith.constant 0 : index
    %c0_10 = arith.constant 0 : index
    %c0_11 = arith.constant 0 : index
    %11 = vector.load %arg4[%c0_9, %c0_10, %c0_11] : memref<1x2x128xf32, #tpu.memory_space<vmem>>, vector<1x2x128xf32>
    %12 = vector.shape_cast %11 : vector<1x2x128xf32> to vector<2x128xf32>
    %13 = vector.shape_cast %10 : vector<2x128xf32> to vector<1x2x128xf32>
    tpu.vector_store %arg4[%c0_9, %c0_10, %c0_11], %13 {strides = array<i32>} : memref<1x2x128xf32, #tpu.memory_space<vmem>>, vector<1x2x128xf32>,
    %c0_12 = arith.constant 0 : index
    %c0_13 = arith.constant 0 : index
    %c0_14 = arith.constant 0 : index
    %14 = vector.load %arg5[%c0_12, %c0_13, %c0_14] : memref<1x2x128xf32, #tpu.memory_space<vmem>>, vector<1x2x128xf32>
    %15 = vector.shape_cast %14 : vector<1x2x128xf32> to vector<2x128xf32>
    %cst_15 = arith.constant dense<0.000000e+00> : vector<2x128xf32>
    %16 = vector.multi_reduction <add>, %6, %cst_15 [1] : vector<2x8x128xf32> to vector<2x128xf32>
    %17 = arith.addf %15, %16 : vector<2x128xf32>
    %c0_16 = arith.constant 0 : index
    %c0_17 = arith.constant 0 : index
    %c0_18 = arith.constant 0 : index
    %18 = vector.load %arg5[%c0_16, %c0_17, %c0_18] : memref<1x2x128xf32, #tpu.memory_space<vmem>>, vector<1x2x128xf32>
    %19 = vector.shape_cast %18 : vector<1x2x128xf32> to vector<2x128xf32>
    %20 = vector.shape_cast %17 : vector<2x128xf32> to vector<1x2x128xf32>
    tpu.vector_store %arg5[%c0_16, %c0_17, %c0_18], %20 {strides = array<i32>} : memref<1x2x128xf32, #tpu.memory_space<vmem>>, vector<1x2x128xf32>,
    return
  }
  func.func @transform_0(%arg0: i32, %arg1: i32) -> (i32, i32, i32) {
    %c1_i32 = arith.constant 1 : i32
    %0 = arith.muli %arg0, %c1_i32 : i32
    %1 = arith.addi %0, %arg1 : i32
    %c0_i32 = arith.constant 0 : i32
    %c0_i32_0 = arith.constant 0 : i32
    %c0_i32_1 = arith.constant 0 : i32
    return %c0_i32, %1, %c0_i32_0 : i32, i32, i32
  }
  func.func @transform_1(%arg0: i32, %arg1: i32) -> (i32, i32, i32) {
    %c1_i32 = arith.constant 1 : i32
    %0 = arith.muli %arg0, %c1_i32 : i32
    %1 = arith.addi %0, %arg1 : i32
    %c0_i32 = arith.constant 0 : i32
    %c0_i32_0 = arith.constant 0 : i32
    %c0_i32_1 = arith.constant 0 : i32
    return %c0_i32, %1, %c0_i32_0 : i32, i32, i32
  }
  func.func @transform_2(%arg0: i32, %arg1: i32) -> (i32, i32, i32) {
    %c0_i32 = arith.constant 0 : i32
    %c0_i32_0 = arith.constant 0 : i32
    %c0_i32_1 = arith.constant 0 : i32
    return %arg0, %c0_i32, %c0_i32_0 : i32, i32, i32
  }
  func.func @transform_3(%arg0: i32, %arg1: i32) -> (i32, i32, i32) {
    %c0_i32 = arith.constant 0 : i32
    %c0_i32_0 = arith.constant 0 : i32
    %c0_i32_1 = arith.constant 0 : i32
    return %arg0, %c0_i32, %c0_i32_0 : i32, i32, i32
  }
}

</mosaic_0001>

<bundles_post_ra>
// kernel: soft_dice_loss.1
= control target key start
LH: loop header
LB: loop body
LE: loop exit
PB: predicated region body
PF: predicated region fallthrough
CT: control target
= control target key end

     0   :  { %v121_v0 = vmov 0.0   ;;  %vm76_vm0 = vcmask 1041409   ;;  %s172_s2 = inlined_call_operand.vmem [shape: f32[1,2,128], index: 2, kind: output, shape index: {0}]   ;;  %s173_s3 = inlined_call_operand.vmem [shape: f32[1,2,128], index: 3, kind: output, shape index: {1}]   ;;  %s174_s0 = inlined_call_operand.vmem [shape: f32[2,8,128], index: 0, kind: input, shape index: {}]   ;;  %s175_s1 = inlined_call_operand.vmem [shape: f32[2,8,128], index: 1, kind: input, shape index: {}]  }
   0x1   :  { %51 = vst [vmem:[%s172_s2] sm:$0x3] %v121_v0  ;;  %52 = vst [vmem:[%s173_s3] sm:$0x3] %v121_v0  ;;  %v53_v1 = vld [vmem:[%s174_s0] sm:$0xff]  ;;  %v54_v2 = vld [vmem:[%s174_s0 + $0x8] sm:$0xff] }
   0x2   :  { %v55_v3 = vld [vmem:[%s175_s1] sm:$0xff]  ;;  %v56_v4 = vld [vmem:[%s175_s1 + $0x8] sm:$0xff] }
   0x3   :  { %v57_v5 = vmul.f32 %v55_v3, %v53_v1  ;;  %v59_v6 = vadd.f32 %v55_v3, %v53_v1  ;;  %v58_v7 = vmul.f32 %v56_v4, %v54_v2  ;;  %v60_v8 = vadd.f32 %v56_v4, %v54_v2 }
   0x5   :  { %v62_v9 = vrot.slane %v57_v5, 4  ;;  %v82_v10 = vrot.slane %v59_v6, 4  ;;  %v68_v11 = vrot.slane %v58_v7, 4  ;;  %v88_v12 = vrot.slane %v60_v8, 4 }
   0x7   :  { %v63_v13 = vadd.f32 %v62_v9, %v57_v5  ;;  %v83_v14 = vadd.f32 %v82_v10, %v59_v6  ;;  %v69_v15 = vadd.f32 %v68_v11, %v58_v7  ;;  %v89_v16 = vadd.f32 %v88_v12, %v60_v8 }
   0x8   :  { %v61_v31 = vld [vmem:[%s172_s2] sm:$0x3] }
   0x9   :  { %v64_v17 = vrot.slane %v63_v13, 2  ;;  %v84_v18 = vrot.slane %v83_v14, 2  ;;  %v70_v19 = vrot.slane %v69_v15, 2  ;;  %v90_v20 = vrot.slane %v89_v16, 2  ;;  %v81_v33 = vld [vmem:[%s173_s3] sm:$0x3] }
   0xb   :  { %v65_v21 = vadd.f32 %v64_v17, %v63_v13  ;;  %v85_v22 = vadd.f32 %v84_v18, %v83_v14  ;;  %v71_v23 = vadd.f32 %v70_v19, %v69_v15  ;;  %v91_v24 = vadd.f32 %v90_v20, %v89_v16 }
   0xd   :  { %v66_v25 = vrot.slane %v65_v21, 1  ;;  %v86_v26 = vrot.slane %v85_v22, 1  ;;  %v72_v27 = vrot.slane %v71_v23, 1  ;;  %v92_v28 = vrot.slane %v91_v24, 1 }
   0xf   :  { %v67_v29 = vadd.f32 %v66_v25, %v65_v21  ;;  %v87_v30 = vadd.f32 %v86_v26, %v85_v22  ;;  %v73_v32 = vadd.f32 %v72_v27, %v71_v23  ;;  %v93_v34 = vadd.f32 %v92_v28, %v91_v24 }
  0x11   :  { %v77_v35 = vsel %vm76_vm0, %v73_v32, %v67_v29  ;;  %v96_v36 = vsel %vm76_vm0, %v93_v34, %v87_v30 }
  0x12   :  { %v79_v37 = vadd.f32 %v77_v35, %v61_v31  ;;  %v98_v38 = vadd.f32 %v96_v36, %v81_v33 }
  0x14   :  { %80 = vst [vmem:[%s172_s2] sm:$0x3] %v79_v37  ;;  %99 = vst [vmem:[%s173_s3] sm:$0x3] %v98_v38 }

</bundles_post_ra>
